<compile_context>
chip_gen: v7x
topology: tpu7x:2x2x1
jax: 0.10.0
libtpu: 0.0.40
codegen_flags: <defaults>
</compile_context>

<pallas_src>
import jax
import jax.numpy as jnp
from jax.experimental import pallas as pl
from jax.experimental.pallas import tpu as pltpu

_LANES = 128


def _round_up(x, m):
    return ((x + m - 1) // m) * m


def xor_mlp_kernel(p_ref, x_ref, o_ref):
    # p_ref: (9,) f32 in SMEM (scalar-prefetched):
    #        [w1_00, w1_01, w1_10, w1_11, b1_0, b1_1, w2_00, w2_01, b2_0]
    # x_ref: (2, bs, 128) input dtype  (feature-major, sublane/lane dense)
    # o_ref: (bs, 128)   f32
    x0 = x_ref[0].astype(jnp.float32)        # (bs, 128)
    x1 = x_ref[1].astype(jnp.float32)        # (bs, 128)

    # Linear1 + Sigmoid: pure VPU FMAs + EUP transcendentals.
    h0 = jax.nn.sigmoid(p_ref[0] * x0 + p_ref[1] * x1 + p_ref[4])
    h1 = jax.nn.sigmoid(p_ref[2] * x0 + p_ref[3] * x1 + p_ref[5])

    # Linear2: single output row of FMAs.
    o_ref[...] = (p_ref[6] * h0 + p_ref[7] * h1 + p_ref[8]).astype(o_ref.dtype)


def xor_mlp(x, w1, b1, w2, b2, *, block_rows=2048):
    """Forward pass matching PyTorch: sigmoid(x @ w1.T + b1) @ w2.T + b2.

    x:  (N, 2)   w1: (2, 2) (out, in)   b1: (2,)   w2: (1, 2)   b2: (1,)
    returns (N, 1) f32
    """
    n = x.shape[0]

    # Row-block (sublane) size: MiB-scale per grid step, multiple of 8, and
    # clamped for small batches so we never over-pad tiny inputs.
    n_rows = max(pl.cdiv(n, _LANES), 1)
    bs = min(_round_up(max(block_rows, 8), 8), _round_up(n_rows, 8))
    n_rows_pad = _round_up(n_rows, bs)
    n_pad = n_rows_pad * _LANES

    # Pad only the ragged tail, then one pass to the feature-major dense
    # layout (2, n_rows_pad, 128).  Padded lanes compute garbage that is
    # sliced off below.
    x_p = jnp.pad(x, ((0, n_pad - n), (0, 0)))
    x_fm = jnp.transpose(x_p.reshape(n_rows_pad, _LANES, 2), (2, 0, 1))

    # All 9 parameters packed into one SMEM-prefetched array.
    params = jnp.concatenate(
        [w1.reshape(-1), b1.reshape(-1), w2.reshape(-1), b2.reshape(-1)]
    ).astype(jnp.float32)

    itemsize = jnp.dtype(x_fm.dtype).itemsize
    cost = pl.CostEstimate(
        flops=12 * n_pad,
        transcendentals=2 * n_pad,
        bytes_accessed=2 * n_pad * itemsize + 4 * n_pad + params.size * 4,
    )

    out = pl.pallas_call(
        xor_mlp_kernel,
        out_shape=jax.ShapeDtypeStruct((n_rows_pad, _LANES), jnp.float32),
        grid_spec=pltpu.PrefetchScalarGridSpec(
            num_scalar_prefetch=1,                       # params -> SMEM
            grid=(n_rows_pad // bs,),
            in_specs=[
                pl.BlockSpec((2, bs, _LANES), lambda i, p: (0, i, 0)),
            ],
            out_specs=pl.BlockSpec((bs, _LANES), lambda i, p: (i, 0)),
        ),
        compiler_params=pltpu.CompilerParams(
            dimension_semantics=("parallel",),           # pipelining + v7x megacore
        ),
        cost_estimate=cost,
    )(params, x_fm)

    # Back to the PyTorch (N, 1) convention; drop tail padding.
    return out.reshape(-1)[:n].reshape(n, 1)


def init_params(key):
    # PyTorch nn.Linear default init: U(-1/sqrt(fan_in), 1/sqrt(fan_in)).
    k1, k2, k3, k4 = jax.random.split(key, 4)
    bound = 1.0 / jnp.sqrt(2.0)          # fan_in = 2 for both layers
    w1 = jax.random.uniform(k1, (2, 2), jnp.float32, -bound, bound)  # (out, in)
    b1 = jax.random.uniform(k2, (2,),   jnp.float32, -bound, bound)
    w2 = jax.random.uniform(k3, (1, 2), jnp.float32, -bound, bound)  # (out, in)
    b2 = jax.random.uniform(k4, (1,),   jnp.float32, -bound, bound)
    return w1, b1, w2, b2


if __name__ == "__main__":
    key = jax.random.PRNGKey(0)
    kx, kp = jax.random.split(key)

    # Small batch of 2-D XOR-style inputs (batch=8, features=2).
    x = jax.random.uniform(kx, (8, 2), jnp.float32)
    w1, b1, w2, b2 = init_params(kp)

    out = xor_mlp(x, w1, b1, w2, b2)
    out = jax.block_until_ready(out)

    # Reference in plain JAX (same math as the PyTorch forward).
    ref = jax.nn.sigmoid(x @ w1.T + b1) @ w2.T + b2
    assert out.shape == (8, 1)
    assert jnp.allclose(out, ref, atol=1e-5), "mismatch vs reference"

    print("KERNEL_OK")
</pallas_src>

<mosaic_0001>
module attributes {stable_mosaic.version = 11 : i64} {
  func.func @xor_mlp_kernel(%arg0: i32, %arg1: memref<9xf32, #tpu.memory_space<smem>>, %arg2: memref<2x8x128xf32, #tpu.memory_space<vmem>>, %arg3: memref<8x128xf32, #tpu.memory_space<vmem>>) attributes {dimension_semantics = [#tpu.dimension_semantics<parallel>], iteration_bounds = array<i64: 1>, scalar_prefetch = 1 : i64, scratch_operands = 0 : i64, tpu.core_type = #tpu.core_type<tc>, window_params = [{transform_indices = @transform_0, window_bounds = array<i64: 2, 8, 128>}, {transform_indices = @transform_1, window_bounds = array<i64: 8, 128>}]} {
    %c0 = arith.constant 0 : index
    %c0_0 = arith.constant 0 : index
    %c0_1 = arith.constant 0 : index
    %0 = vector.load %arg2[%c0, %c0_0, %c0_1] : memref<2x8x128xf32, #tpu.memory_space<vmem>>, vector<1x8x128xf32>
    %1 = vector.shape_cast %0 : vector<1x8x128xf32> to vector<8x128xf32>
    %c1 = arith.constant 1 : index
    %c0_2 = arith.constant 0 : index
    %c0_3 = arith.constant 0 : index
    %2 = vector.load %arg2[%c1, %c0_2, %c0_3] : memref<2x8x128xf32, #tpu.memory_space<vmem>>, vector<1x8x128xf32>
    %3 = vector.shape_cast %2 : vector<1x8x128xf32> to vector<8x128xf32>
    %c0_4 = arith.constant 0 : index
    %4 = memref.load %arg1[%c0_4] : memref<9xf32, #tpu.memory_space<smem>>
    %5 = vector.broadcast %4 : f32 to vector<8x128xf32>
    %6 = arith.mulf %5, %1 : vector<8x128xf32>
    %c1_5 = arith.constant 1 : index
    %7 = memref.load %arg1[%c1_5] : memref<9xf32, #tpu.memory_space<smem>>
    %8 = vector.broadcast %7 : f32 to vector<8x128xf32>
    %9 = arith.mulf %8, %3 : vector<8x128xf32>
    %10 = arith.addf %6, %9 : vector<8x128xf32>
    %c4 = arith.constant 4 : index
    %11 = memref.load %arg1[%c4] : memref<9xf32, #tpu.memory_space<smem>>
    %12 = vector.broadcast %11 : f32 to vector<8x128xf32>
    %13 = arith.addf %10, %12 : vector<8x128xf32>
    %14 = arith.negf %13 : vector<8x128xf32>
    %15 = math.exp %14 : vector<8x128xf32>
    %cst = arith.constant 1.000000e+00 : f32
    %16 = vector.broadcast %cst : f32 to vector<8x128xf32>
    %17 = arith.addf %16, %15 : vector<8x128xf32>
    %18 = arith.divf %16, %17 : vector<8x128xf32>
    %c2 = arith.constant 2 : index
    %19 = memref.load %arg1[%c2] : memref<9xf32, #tpu.memory_space<smem>>
    %20 = vector.broadcast %19 : f32 to vector<8x128xf32>
    %21 = arith.mulf %20, %1 : vector<8x128xf32>
    %c3 = arith.constant 3 : index
    %22 = memref.load %arg1[%c3] : memref<9xf32, #tpu.memory_space<smem>>
    %23 = vector.broadcast %22 : f32 to vector<8x128xf32>
    %24 = arith.mulf %23, %3 : vector<8x128xf32>
    %25 = arith.addf %21, %24 : vector<8x128xf32>
    %c5 = arith.constant 5 : index
    %26 = memref.load %arg1[%c5] : memref<9xf32, #tpu.memory_space<smem>>
    %27 = vector.broadcast %26 : f32 to vector<8x128xf32>
    %28 = arith.addf %25, %27 : vector<8x128xf32>
    %29 = arith.negf %28 : vector<8x128xf32>
    %30 = math.exp %29 : vector<8x128xf32>
    %cst_6 = arith.constant 1.000000e+00 : f32
    %31 = vector.broadcast %cst_6 : f32 to vector<8x128xf32>
    %32 = arith.addf %31, %30 : vector<8x128xf32>
    %33 = arith.divf %31, %32 : vector<8x128xf32>
    %c6 = arith.constant 6 : index
    %34 = memref.load %arg1[%c6] : memref<9xf32, #tpu.memory_space<smem>>
    %35 = vector.broadcast %34 : f32 to vector<8x128xf32>
    %36 = arith.mulf %35, %18 : vector<8x128xf32>
    %c7 = arith.constant 7 : index
    %37 = memref.load %arg1[%c7] : memref<9xf32, #tpu.memory_space<smem>>
    %38 = vector.broadcast %37 : f32 to vector<8x128xf32>
    %39 = arith.mulf %38, %33 : vector<8x128xf32>
    %40 = arith.addf %36, %39 : vector<8x128xf32>
    %c8 = arith.constant 8 : index
    %41 = memref.load %arg1[%c8] : memref<9xf32, #tpu.memory_space<smem>>
    %42 = vector.broadcast %41 : f32 to vector<8x128xf32>
    %43 = arith.addf %40, %42 : vector<8x128xf32>
    %c0_7 = arith.constant 0 : index
    %c0_8 = arith.constant 0 : index
    %44 = vector.load %arg3[%c0_7, %c0_8] : memref<8x128xf32, #tpu.memory_space<vmem>>, vector<8x128xf32>
    tpu.vector_store %arg3[%c0_7, %c0_8], %43 {strides = array<i32>} : memref<8x128xf32, #tpu.memory_space<vmem>>, vector<8x128xf32>,
    return
  }
  func.func @transform_0(%arg0: i32, %arg1: memref<9xf32, #tpu.memory_space<smem>>) -> (i32, i32, i32) {
    %c0_i32 = arith.constant 0 : i32
    %c0_i32_0 = arith.constant 0 : i32
    %c0_i32_1 = arith.constant 0 : i32
    return %c0_i32, %arg0, %c0_i32_0 : i32, i32, i32
  }
  func.func @transform_1(%arg0: i32, %arg1: memref<9xf32, #tpu.memory_space<smem>>) -> (i32, i32) {
    %c0_i32 = arith.constant 0 : i32
    %c0_i32_0 = arith.constant 0 : i32
    return %arg0, %c0_i32 : i32, i32
  }
}

</mosaic_0001>

<bundles_post_ra>
// kernel: tpu_custom_call.1
= control target key start
LH: loop header
LB: loop body
LE: loop exit
PB: predicated region body
PF: predicated region fallthrough
CT: control target
= control target key end

     0   :  { %s228_s0 = inlined_call_operand.hbm [shape: f32[9], index: 0, kind: input, shape index: {}]   ;;  %s229_s1 = inlined_call_operand.hbm [shape: f32[2,8,128], index: 1, kind: input, shape index: {}]   ;;  %s230_s2 = inlined_call_operand.hbm [shape: f32[8,128], index: 2, kind: output, shape index: {}]  }
   0x1   :  { %s112_s11 = scalar_lea.hbm %s228_s0, 16 }
   0x2   :  { %p113_p0 = scmp.ne.s32.totalorder %s228_s0, %s112_s11  ;;  %p116_p1 = scmp.lt.u32.totalorder %s112_s11, %s228_s0 }
   0x4   :  { %p118_p2 = pnand %p116_p1, %p113_p0 }
   0x6   :  { %121 = shalt.err (!%p118_p2)  }
   0x7   :  { %s172_s16 = smov [#allocation3]  }
   0x8   :  { %8 = dma.hbm_to_smem %s228_s0, 16, %s172_s16, [#allocation2] }
   0x9   :  { %166 = dma.done.wait [#allocation2], 16 }
   0xa   :  { %167 = vsyncadd [#allocation2], 4294967280 }
   0xb   :  { %10 = sfence }
   0xc   :  { %11 = vsyncpa [#allocation5], 0 }
   0xd   :  { %12 = vsyncpa [#allocation6], 0  ;;  %s173_s19 = smov [#allocation4]   ;;  %s122_s23 = scalar_lea.hbm %s229_s1, 256 }
   0xe   :  { %s18_s20 = sshll.u32 %s173_s19, 4  ;;  %p123_p3 = scmp.ne.s32.totalorder %s229_s1, %s122_s23  ;;  %s19_s20 = int_to_ptr.vmem [resolvable:$true] %s18_s20 }
   0xf   :  { %p126_p4 = scmp.lt.u32.totalorder %s122_s23, %s229_s1 }
  0x11   :  { %p128_p5 = pnand %p126_p4, %p123_p3 }
  0x13   :  { %131 = shalt.err (!%p128_p5)
}
  0x14   :  { %s132_s0 = scalar_lea.vmem %s19_s20, 256  ;;  %p137_p7 = scmp.lt.s32.totalorder %s19_s20, %s19_s20 }
  0x15   :  { %p133_p6 = scmp.ne.s32.totalorder %s19_s20, %s132_s0  ;;  %p138_p8 = scmp.lt.s32.totalorder %s132_s0, %s132_s0 }
  0x17   :  { %p139_p9 = por %p138_p8, %p137_p7 }
  0x19   :  { %p140_p10 = pnand %p139_p9, %p133_p6 }
  0x1b   :  { %143 = shalt.err (!%p140_p10)
}
  0x1c   :  { %s174_s28 = smov 128   ;;  %s175_s29 = smov 8  }
  0x1d   :  { %24 = dma.hbm_to_vmem [thread:$0]  %s229_s1, 256, %s19_s20, [#allocation5], %s174_s28, %s174_s28, %s175_s29  }
  0x1e   :  { %168 = dma.done.wait [#allocation5], 256  }
  0x1f   :  { %169 = vsyncadd [#allocation5], 4294967040  ;;  %s31_s4 = sld [smem:[#allocation3]]  ;;  %s89_s5 = sld [smem:[#allocation3 + $0x1]]  ;;  %v28_v0 = vld [vmem:[#allocation4] sm:$0xff]  ;;  %v30_v1 = vld [vmem:[#allocation4 + $0x8] sm:$0xff] }
  0x20   :  { %s90_s6 = sld [smem:[#allocation3 + $0x4]]  ;;  %s92_s7 = sld [smem:[#allocation3 + $0x2]] }
  0x21   :  { %s93_s8 = sld [smem:[#allocation3 + $0x3]]  ;;  %s94_s9 = sld [smem:[#allocation3 + $0x5]] }
  0x22   :  { %s96_s1 = sld [smem:[#allocation3 + $0x6]]  ;;  %s97_s10 = sld [smem:[#allocation3 + $0x7]] }
  0x23   :  { %s98_s11 = sld [smem:[#allocation3 + $0x8]]  ;;  %s176_s12 = smov [#allocation7]  }
  0x24   :  { %s80_s13 = sshll.u32 %s176_s12, 4  ;;  %s81_s13 = int_to_ptr.vmem [resolvable:$true] %s80_s13 }
  0x25   :  { %v32_v2 = vstv %s31_s4  ;;  %v35_v3 = vstv %s89_s5  ;;  %s144_s14 = scalar_lea.vmem %s81_s13, 128  ;;  %p149_p12 = scmp.lt.s32.totalorder %s81_s13, %s81_s13 }
  0x26   :  { %v33_v4 = vmul.f32 %v32_v2, %v28_v0  ;;  %v36_v5 = vmul.f32 %v35_v3, %v30_v1  ;;  %v48_v6 = vstv %s92_s7  ;;  %v39_v7 = vstv %s90_s6  ;;  %p145_p11 = scmp.ne.s32.totalorder %s81_s13, %s144_s14  ;;  %p150_p13 = scmp.lt.s32.totalorder %s144_s14, %s144_s14 }
  0x27   :  { %v49_v8 = vmul.f32 %v48_v6, %v28_v0  ;;  %v51_v9 = vstv %s93_s8  ;;  %v55_v12 = vstv %s94_s9 }
  0x28   :  { %v37_v10 = vadd.f32 %v36_v5, %v33_v4  ;;  %v52_v11 = vmul.f32 %v51_v9, %v30_v1  ;;  %v64_v22 = vstv %s96_s1  ;;  %v67_v24 = vstv %s97_s10  ;;  %p151_p0 = por %p150_p13, %p149_p12 }
  0x29   :  { %v71_v28 = vstv %s98_s11 }
  0x2a   :  { %v40_v13 = vadd.f32 %v39_v7, %v37_v10  ;;  %v53_v14 = vadd.f32 %v52_v11, %v49_v8  ;;  %p152_p1 = pnand %p151_p0, %p145_p11 }
  0x2c   :  { %v91_v15 = vmul.f32 -1.442695, %v40_v13  ;;  %v56_v16 = vadd.f32 %v55_v12, %v53_v14 }
  0x2e   :  { %104 = vpow2.f32 %v91_v15  ;;  %v95_v17 = vmul.f32 -1.442695, %v56_v16 }
  0x30   :  { %106 = vpow2.f32 %v95_v17 }
  0x38   :  { %v105_v18 = vpop.eup %104 }
  0x39   :  { %v44_v19 = vadd.f32 1.0, %v105_v18 }
  0x3a   :  { %v107_v20 = vpop.eup %106 }
  0x3b   :  { %108 = vrcp.f32 %v44_v19  ;;  %v60_v21 = vadd.f32 1.0, %v107_v20 }
  0x3d   :  { %110 = vrcp.f32 %v60_v21 }
  0x45   :  { %v109_v23 = vpop.eup %108 }
  0x46   :  { %v65_v25 = vmul.f32 %v109_v23, %v64_v22 }
  0x47   :  { %v111_v26 = vpop.eup %110 }
  0x48   :  { %v68_v27 = vmul.f32 %v111_v26, %v67_v24 }
  0x4a   :  { %v69_v29 = vadd.f32 %v68_v27, %v65_v25 }
  0x4c   :  { %v72_v30 = vadd.f32 %v71_v28, %v69_v29 }
  0x4e   :  { %73 = vst [vmem:[#allocation7] sm:$0xff] %v72_v30 }
  0x4f   :  { %155 = shalt.err (!%p152_p1)
}
  0x50   :  { %s156_s17 = scalar_lea.hbm %s230_s2, 128 }
  0x51   :  { %p157_p2 = scmp.ne.s32.totalorder %s230_s2, %s156_s17  ;;  %p160_p3 = scmp.lt.u32.totalorder %s156_s17, %s230_s2 }
  0x53   :  { %p162_p4 = pnand %p160_p3, %p157_p2 }
  0x55   :  { %165 = shalt.err (!%p162_p4)
}
  0x56   :  { %83 = dma.vmem_to_hbm [thread:$0]  %s81_s13, 128, %s230_s2, [#allocation6]  }
  0x57   :  { %170 = dma.done.wait [#allocation6], 128  }
  0x58   :  { %171 = vsyncadd [#allocation6], 4294967168 }
  0x59   :  { %87 = vsyncpa [#allocation5], 1 }
  0x5a   :  { %88 = vsyncpa [#allocation6], 1 }

</bundles_post_ra>
